<compile_context>
chip_gen: v6e
topology: v6e:2x2x1
jax: 0.10.0
libtpu: 0.0.40
codegen_flags: <defaults>
</compile_context>

<pallas_src>
import functools

import numpy as np
import jax
import jax.numpy as jnp
from jax import lax
from jax.experimental import pallas as pl
from jax.experimental.pallas import tpu as pltpu


_TM_CANDIDATES = (1024, 512, 256, 128, 64, 32, 16, 8)


def _round_up(x, m):
    return ((x + m - 1) // m) * m


def _vmem_config():
    """Generation-aware VMEM budget / scoped limit / minimum grid steps."""
    cap = 64 * 1024 * 1024  # conservative default (v7x-class) if detection fails
    try:
        info = pltpu.get_tpu_info()
        c = getattr(info, "vmem_capacity_bytes", None)
        if c:
            cap = int(c)
    except Exception:
        pass
    if cap >= 100 * 1024 * 1024:
        # v5e / v6e: 128 MiB physical VMEM, single TensorCore -> >=2 grid steps.
        return dict(budget=80 * 1024 * 1024, limit=100 * 1024 * 1024, min_grid=2)
    # v7x-class: 64 MiB VMEM, 2 TensorCores -> want >=2 steps per core (grid >= 4).
    return dict(budget=36 * 1024 * 1024, limit=48 * 1024 * 1024, min_grid=4)


def _pick_tk(K, n_cols, in_bytes, budget):
    """Whole-K resident weight tile when cheap, otherwise K-tiles in multiples of 128."""
    if 2 * K * n_cols * in_bytes <= budget // 3 or K <= 128:
        return K
    tk = (budget // 3) // (2 * n_cols * in_bytes)
    tk = max(128, (tk // 128) * 128)
    return K if tk >= K else tk


def _pick_tm(m_rows, tk, n_cols, in_bytes, out_bytes, budget, min_grid):
    """Largest row tile under the VMEM budget with >= min_grid grid steps.
    The weight/bias operands are counted double-buffered (Pallas default is 2 buffers
    per input even for constant index_maps; pl.Buffered(1) would halve that)."""
    for cand in _TM_CANDIDATES:
        est = (2 * cand * tk * in_bytes          # double-buffered x tile
               + 2 * cand * n_cols * out_bytes   # double-buffered output tile
               + cand * n_cols * 4               # f32 accumulator scratch
               + 2 * tk * n_cols * in_bytes      # weight tile (2 buffers)
               + 2 * n_cols * 4)                 # bias (2 buffers)
        if est <= budget and (pl.cdiv(m_rows, cand) >= min_grid
                              or cand == _TM_CANDIDATES[-1]):
            return cand
    return _TM_CANDIDATES[-1]


# ------------------------------------------------------------------ generic matmul kernel
def _matmul_bias_kernel(x_ref, w_ref, b_ref, o_ref, acc_ref, *, relu):
    # x_ref: (tm, tk), w_ref: (tk, Np), b_ref: (1, Np), o_ref: (tm, Np), acc_ref f32.
    k = pl.program_id(1)

    @pl.when(k == 0)
    def _():
        acc_ref[...] = jnp.zeros_like(acc_ref)

    acc = acc_ref[...] + jnp.dot(x_ref[...], w_ref[...],
                                 preferred_element_type=jnp.float32)
    acc_ref[...] = acc

    @pl.when(k == pl.num_programs(1) - 1)
    def _():
        r = acc + b_ref[...]
        if relu:
            r = jnp.maximum(r, 0.0)
        o_ref[...] = r.astype(o_ref.dtype)


def _tiled_matmul_bias(xrows, wmat, bvec, *, relu, compute_dtype, out_dtype):
    """out[:M, :Nc] = act(xrows @ wmat + bvec); rows 'parallel', K reduction 'arbitrary'."""
    M, K = xrows.shape
    Nc = wmat.shape[1]
    cfg = _vmem_config()

    # Lane-dense output: pad columns to a multiple of 128 (unmasked stores).
    Np = _round_up(Nc, 128)
    if Np != Nc:
        wmat = jnp.pad(wmat, ((0, 0), (0, Np - Nc)))
        bvec = jnp.pad(bvec, ((0, 0), (0, Np - Nc)))

    xs = xrows.astype(compute_dtype)
    ws = wmat.astype(compute_dtype)
    bs = bvec.astype(jnp.float32)

    in_bytes = jnp.dtype(compute_dtype).itemsize
    out_bytes = jnp.dtype(out_dtype).itemsize

    tk = _pick_tk(K, Np, in_bytes, cfg["budget"])
    Kp = K if tk == K else _round_up(K, tk)
    if Kp != K:                                   # zero-pad K: contributes nothing
        xs = jnp.pad(xs, ((0, 0), (0, Kp - K)))
        ws = jnp.pad(ws, ((0, Kp - K), (0, 0)))
    gk = Kp // tk

    tm = _pick_tm(M, tk, Np, in_bytes, out_bytes, cfg["budget"], cfg["min_grid"])
    gm = int(pl.cdiv(M, tm))
    Mp = gm * tm
    if Mp != M:                                   # ragged tail: zero-padded rows
        xs = jnp.pad(xs, ((0, Mp - M), (0, 0)))

    out = pl.pallas_call(
        functools.partial(_matmul_bias_kernel, relu=relu),
        out_shape=jax.ShapeDtypeStruct((Mp, Np), out_dtype),
        grid_spec=pltpu.PrefetchScalarGridSpec(
            num_scalar_prefetch=0,
            grid=(gm, gk),
            in_specs=[
                pl.BlockSpec((tm, tk), lambda i, k: (i, k)),
                pl.BlockSpec((tk, Np), lambda i, k: (k, 0)),
                pl.BlockSpec((1, Np), lambda i, k: (0, 0)),
            ],
            out_specs=pl.BlockSpec((tm, Np), lambda i, k: (i, 0)),
            scratch_shapes=[pltpu.VMEM((tm, Np), jnp.float32)],
        ),
        compiler_params=pltpu.CompilerParams(
            dimension_semantics=("parallel", "arbitrary"),
            vmem_limit_bytes=cfg["limit"],
        ),
    )(xs, ws, bs)
    return out[:M, :Nc]


# ----------------------------------------------------------------------------- stage 1: deconv
def _single_deconv3d(x_cl, w1, b1, *, compute_dtype):
    """ConvTranspose3d(kernel=(2,2,1), stride=(2,2,1), pad=0), channels-last in/out."""
    N, D, H, W, Ci = x_cl.shape
    Co = w1.shape[1]
    M = N * D * H * W

    # Weight columns ordered (kd, kh, co) with co fastest; bias tiled to match.
    wmat = jnp.transpose(w1[..., 0], (0, 2, 3, 1)).reshape(Ci, 4 * Co)
    bvec = jnp.tile(b1, 4).reshape(1, 4 * Co)

    # Intermediate emitted directly in compute_dtype (halves its HBM traffic in bf16 mode).
    y = _tiled_matmul_bias(x_cl.reshape(M, Ci), wmat, bvec,
                           relu=False, compute_dtype=compute_dtype,
                           out_dtype=compute_dtype)

    # (kd, kh) scatter to the strided output positions — pure layout, in compute_dtype.
    # TODO(synk): fuse this scatter + the stage-2 halo gather into one spatial-grid kernel
    # so the scattered intermediate never round-trips HBM.
    y = y.reshape(N, D, H, W, 2, 2, Co)
    y = jnp.transpose(y, (0, 1, 4, 2, 5, 3, 6))            # (N, D, kd, H, kh, W, Co)
    return y.reshape(N, 2 * D, 2 * H, W, Co)


# ----------------------------------------------- stage 2: conv 3x3x3 (pad 1) + BN(eval) + ReLU
def _conv3d_tap_kernel(x_ref, w_ref, b_ref, o_ref, acc_ref, *, H, W, C, weight_per_kz):
    # x_ref: (1, 1, H+2, W+2, C) padded depth slice d+kz; acc_ref/o_ref rows = H*W.
    kz = pl.program_id(2)

    @pl.when(kz == 0)
    def _():
        acc_ref[...] = jnp.zeros_like(acc_ref)

    acc = acc_ref[...]
    for ky in range(3):
        for kx in range(3):
            tap = x_ref[0, 0, ky:ky + H, kx:kx + W, :].reshape(H * W, C)
            if weight_per_kz:
                wk = w_ref[0, 3 * ky + kx]                  # (C, Np), streamed per kz
            else:
                wk = w_ref[kz * 9 + 3 * ky + kx]            # (C, Np), resident weight
            acc = acc + jnp.dot(tap, wk, preferred_element_type=jnp.float32)
    acc_ref[...] = acc

    @pl.when(kz == pl.num_programs(2) - 1)
    def _():
        r = acc + b_ref[...]
        o_ref[0, 0] = jnp.maximum(r, 0.0).astype(o_ref.dtype)


def _conv3x3x3_bn_relu(a_cl, w2, b2, gamma, beta, running_mean, running_var, eps,
                       *, compute_dtype):
    """Conv3d(k=3, s=1, p=1) + BatchNorm3d(eval, folded) + ReLU, channels-last in/out."""
    N, D, H, W, C = a_cl.shape
    Co = w2.shape[0]
    cfg = _vmem_config()

    # TODO(synk): BatchNorm3d is inference-mode only (running stats folded into the conv);
    # training-mode batch statistics are not computed here.
    scale = gamma * lax.rsqrt(running_var + eps)
    w2f = w2 * scale[:, None, None, None, None]
    b2f = (b2 - running_mean) * scale + beta

    Np = _round_up(Co, 128)
    # Weight rows ordered (kz, ky, kx) -> (27, C, Np); lane-dense padded output columns.
    wmat = jnp.transpose(w2f, (2, 3, 4, 1, 0)).reshape(27, C, Co).astype(compute_dtype)
    bvec = b2f.reshape(1, Co).astype(jnp.float32)
    if Np != Co:
        wmat = jnp.pad(wmat, ((0, 0), (0, 0), (0, Np - Co)))
        bvec = jnp.pad(bvec, ((0, 0), (0, Np - Co)))

    # Cast BEFORE the (single, cheap) spatial pad so all layout glue runs in compute_dtype.
    ap = jnp.pad(a_cl.astype(compute_dtype), ((0, 0), (1, 1), (1, 1), (1, 1), (0, 0)))
    Hp, Wp = H + 2, W + 2

    in_bytes = jnp.dtype(compute_dtype).itemsize
    est_resident = (2 * Hp * Wp * C * in_bytes      # double-buffered halo depth slice
                    + 2 * 27 * C * Np * in_bytes    # resident weight (2 buffers by default)
                    + H * W * Np * 4                # f32 accumulator scratch
                    + 2 * H * W * Np * 4            # double-buffered output tile
                    + 2 * Np * 4)                   # bias
    weight_per_kz = est_resident > cfg["budget"]
    if weight_per_kz:
        # Stream one kz-plane of the weight per step (bounds VMEM at extreme channel counts).
        wmat = wmat.reshape(3, 9, C, Np)
        w_spec = pl.BlockSpec((1, 9, C, Np), lambda n, d, kz: (kz, 0, 0, 0))
    else:
        w_spec = pl.BlockSpec((27, C, Np), lambda n, d, kz: (0, 0, 0))

    # TODO(synk): add H/W tiling (extra 'parallel' grid axes) for very large spatial planes.
    out = pl.pallas_call(
        functools.partial(_conv3d_tap_kernel, H=H, W=W, C=C,
                          weight_per_kz=weight_per_kz),
        out_shape=jax.ShapeDtypeStruct((N, D, H * W, Np), jnp.float32),
        grid_spec=pltpu.PrefetchScalarGridSpec(
            num_scalar_prefetch=0,
            grid=(N, D, 3),                               # kz reduction axis last
            in_specs=[
                # D-halo expressed purely via the index_map: slice d+kz of the padded input.
                pl.BlockSpec((1, 1, Hp, Wp, C), lambda n, d, kz: (n, d + kz, 0, 0, 0)),
                w_spec,
                pl.BlockSpec((1, Np), lambda n, d, kz: (0, 0)),
            ],
            out_specs=pl.BlockSpec((1, 1, H * W, Np), lambda n, d, kz: (n, d, 0, 0)),
            scratch_shapes=[pltpu.VMEM((H * W, Np), jnp.float32)],
        ),
        compiler_params=pltpu.CompilerParams(
            dimension_semantics=("parallel", "parallel", "arbitrary"),
            vmem_limit_bytes=cfg["limit"],
        ),
    )(ap, wmat, bvec)
    return out.reshape(N, D, H, W, Np)[..., :Co]


# -------------------------------------------------------------------------------- full block
def deconv3d_block(x, params, *, eps=1e-5, compute_dtype=jnp.float32):
    """Forward of Deconv3DBlock (deconv -> conv3x3x3 -> BatchNorm(eval) -> ReLU).

    x: (N, Ci, D, H, W)  ->  (N, Co, 2D, 2H, W)
    compute_dtype=jnp.bfloat16 streams operands in bf16 (f32 accumulation) on v6e/v7x.
    """
    x_cl = jnp.transpose(x, (0, 2, 3, 4, 1))               # single boundary transpose
    y1 = _single_deconv3d(x_cl, params["w1"], params["b1"], compute_dtype=compute_dtype)
    y2 = _conv3x3x3_bn_relu(y1, params["w2"], params["b2"],
                            params["gamma"], params["beta"],
                            params["running_mean"], params["running_var"], eps,
                            compute_dtype=compute_dtype)
    return jnp.transpose(y2, (0, 4, 1, 2, 3))              # back to NCDHW


# -------------------------------------------------------------------------------- reference
def _reference(x, params, eps=1e-5):
    w1, b1 = params["w1"], params["b1"]
    w2, b2 = params["w2"], params["b2"]
    g, bt = params["gamma"], params["beta"]
    mu, var = params["running_mean"], params["running_var"]
    N, Ci, D, H, W = x.shape
    Co = w1.shape[1]

    # ConvTranspose3d with kernel == stride == (2,2,1), padding 0 (exact decomposition).
    y = jnp.einsum("ncdhw,cokl->ndhwklo", x, w1[..., 0])
    y = jnp.transpose(y, (0, 6, 1, 4, 2, 5, 3)).reshape(N, Co, 2 * D, 2 * H, W)
    y = y + b1[None, :, None, None, None]

    # Conv3d k=3, stride 1, pad 1.
    y = lax.conv_general_dilated(y, w2, window_strides=(1, 1, 1),
                                 padding=((1, 1), (1, 1), (1, 1)),
                                 dimension_numbers=("NCDHW", "OIDHW", "NCDHW"))
    y = y + b2[None, :, None, None, None]

    # BatchNorm3d (eval) + ReLU.
    scale = (g * lax.rsqrt(var + eps))[None, :, None, None, None]
    y = (y - mu[None, :, None, None, None]) * scale + bt[None, :, None, None, None]
    return jnp.maximum(y, 0.0)


if __name__ == "__main__":
    key = jax.random.PRNGKey(0)
    ks = jax.random.split(key, 9)

    # Small shapes consistent with the module: batch=2, in_planes=4, out_planes=8,
    # spatial D=H=W=4 (block output is (2, 8, 8, 8, 4)).
    N, Ci, Co, D, H, W = 2, 4, 8, 4, 4, 4

    x = jax.random.normal(ks[0], (N, Ci, D, H, W), dtype=jnp.float32)
    params = dict(
        w1=jax.random.normal(ks[1], (Ci, Co, 2, 2, 1), dtype=jnp.float32) * 0.1,
        b1=jax.random.normal(ks[2], (Co,), dtype=jnp.float32) * 0.1,
        w2=jax.random.normal(ks[3], (Co, Co, 3, 3, 3), dtype=jnp.float32) * 0.05,
        b2=jax.random.normal(ks[4], (Co,), dtype=jnp.float32) * 0.05,
        gamma=1.0 + 0.1 * jax.random.normal(ks[5], (Co,), dtype=jnp.float32),
        beta=0.1 * jax.random.normal(ks[6], (Co,), dtype=jnp.float32),
        running_mean=0.1 * jax.random.normal(ks[7], (Co,), dtype=jnp.float32),
        running_var=0.5 + jax.random.uniform(ks[8], (Co,), dtype=jnp.float32),
    )

    out = jax.block_until_ready(deconv3d_block(x, params))
    assert out.shape == (N, Co, 2 * D, 2 * H, W), out.shape

    ref = jax.block_until_ready(_reference(x, params))
    # Tolerance covers MXU matmul vs. XLA conv accumulation-path differences (f32 compute).
    np.testing.assert_allclose(np.asarray(out), np.asarray(ref), rtol=5e-3, atol=5e-3)

    print("KERNEL_OK")
</pallas_src>

<mosaic_0001>
module attributes {stable_mosaic.version = 11 : i64} {
  func.func @_matmul_bias_kernel(%arg0: i32, %arg1: i32, %arg2: memref<32x4xf32, #tpu.memory_space<vmem>>, %arg3: memref<4x128xf32, #tpu.memory_space<vmem>>, %arg4: memref<1x128xf32, #tpu.memory_space<vmem>>, %arg5: memref<32x128xf32, #tpu.memory_space<vmem>>, %arg6: memref<32x128xf32, #tpu.memory_space<vmem>>) attributes {dimension_semantics = [#tpu.dimension_semantics<parallel>, #tpu.dimension_semantics<arbitrary>], iteration_bounds = array<i64: 4, 1>, scalar_prefetch = 0 : i64, scratch_operands = 1 : i64, tpu.core_type = #tpu.core_type<tc>, window_params = [{transform_indices = @transform_0, window_bounds = array<i64: 32, 4>}, {transform_indices = @transform_1, window_bounds = array<i64: 4, 128>}, {pipeline_mode = #tpu.pipeline_mode<synchronous>, transform_indices = @transform_2, window_bounds = array<i64: 1, 128>}, {transform_indices = @transform_3, window_bounds = array<i64: 32, 128>}]} {
    %c0_i32 = arith.constant 0 : i32
    %0 = arith.cmpi eq, %arg1, %c0_i32 : i32
    %1 = arith.extui %0 : i1 to i32
    %c0_i32_0 = arith.constant 0 : i32
    %2 = arith.cmpi ne, %1, %c0_i32_0 : i32
    scf.if %2 {
      %cst_10 = arith.constant 0.000000e+00 : f32
      %12 = vector.broadcast %cst_10 : f32 to vector<32x128xf32>
      %c0_11 = arith.constant 0 : index
      %c0_12 = arith.constant 0 : index
      %13 = vector.load %arg6[%c0_11, %c0_12] : memref<32x128xf32, #tpu.memory_space<vmem>>, vector<32x128xf32>
      tpu.vector_store %arg6[%c0_11, %c0_12], %12 {strides = array<i32>} : memref<32x128xf32, #tpu.memory_space<vmem>>, vector<32x128xf32>,
    } else {
    }
    %c0 = arith.constant 0 : index
    %c0_1 = arith.constant 0 : index
    %3 = vector.load %arg6[%c0, %c0_1] : memref<32x128xf32, #tpu.memory_space<vmem>>, vector<32x128xf32>
    %c0_2 = arith.constant 0 : index
    %c0_3 = arith.constant 0 : index
    %4 = vector.load %arg2[%c0_2, %c0_3] : memref<32x4xf32, #tpu.memory_space<vmem>>, vector<32x4xf32>
    %c0_4 = arith.constant 0 : index
    %c0_5 = arith.constant 0 : index
    %5 = vector.load %arg3[%c0_4, %c0_5] : memref<4x128xf32, #tpu.memory_space<vmem>>, vector<4x128xf32>
    %cst = arith.constant dense<0.000000e+00> : vector<32x128xf32>
    %6 = tpu.matmul %4, %5, %cst {dimension_numbers = #tpu.dot_dimension_numbers<[1], [0], [0], [1], [0, 0, 1, 1], [], []>} : vector<32x4xf32>, vector<4x128xf32>, vector<32x128xf32> -> vector<32x128xf32>
    %7 = arith.addf %3, %6 : vector<32x128xf32>
    %c0_6 = arith.constant 0 : index
    %c0_7 = arith.constant 0 : index
    %8 = vector.load %arg6[%c0_6, %c0_7] : memref<32x128xf32, #tpu.memory_space<vmem>>, vector<32x128xf32>
    tpu.vector_store %arg6[%c0_6, %c0_7], %7 {strides = array<i32>} : memref<32x128xf32, #tpu.memory_space<vmem>>, vector<32x128xf32>,
    %c0_i32_8 = arith.constant 0 : i32
    %9 = arith.cmpi eq, %arg1, %c0_i32_8 : i32
    %10 = arith.extui %9 : i1 to i32
    %c0_i32_9 = arith.constant 0 : i32
    %11 = arith.cmpi ne, %10, %c0_i32_9 : i32
    scf.if %11 {
      %c0_10 = arith.constant 0 : index
      %c0_11 = arith.constant 0 : index
      %12 = vector.load %arg4[%c0_10, %c0_11] : memref<1x128xf32, #tpu.memory_space<vmem>>, vector<1x128xf32>
      %13 = vector.broadcast %12 : vector<1x128xf32> to vector<32x128xf32>
      %14 = arith.addf %7, %13 : vector<32x128xf32>
      %c0_12 = arith.constant 0 : index
      %c0_13 = arith.constant 0 : index
      %15 = vector.load %arg5[%c0_12, %c0_13] : memref<32x128xf32, #tpu.memory_space<vmem>>, vector<32x128xf32>
      tpu.vector_store %arg5[%c0_12, %c0_13], %14 {strides = array<i32>} : memref<32x128xf32, #tpu.memory_space<vmem>>, vector<32x128xf32>,
    } else {
    }
    return
  }
  func.func @transform_0(%arg0: i32, %arg1: i32) -> (i32, i32) {
    %c0_i32 = arith.constant 0 : i32
    return %arg0, %arg1 : i32, i32
  }
  func.func @transform_1(%arg0: i32, %arg1: i32) -> (i32, i32) {
    %c0_i32 = arith.constant 0 : i32
    %c0_i32_0 = arith.constant 0 : i32
    return %arg1, %c0_i32 : i32, i32
  }
  func.func @transform_2(%arg0: i32, %arg1: i32) -> (i32, i32) {
    %c0_i32 = arith.constant 0 : i32
    %c0_i32_0 = arith.constant 0 : i32
    %c0_i32_1 = arith.constant 0 : i32
    return %c0_i32, %c0_i32_0 : i32, i32
  }
  func.func @transform_3(%arg0: i32, %arg1: i32) -> (i32, i32) {
    %c0_i32 = arith.constant 0 : i32
    %c0_i32_0 = arith.constant 0 : i32
    return %arg0, %c0_i32 : i32, i32
  }
}

</mosaic_0001>

<bundles_post_ra>
// kernel: tpu_custom_call.1
= control target key start
LH: loop header
LB: loop body
LE: loop exit
PB: predicated region body
PF: predicated region fallthrough
CT: control target
= control target key end

     0   :  { %8 = vsyncpa [#allocation4], 0  ;;  %s772_s0 = inlined_call_operand.vmem [shape: f32[128,4], index: 0, kind: input, shape index: {}]   ;;  %s773_s1 = inlined_call_operand.vmem [shape: f32[4,128], index: 1, kind: input, shape index: {}]   ;;  %s774_s2 = inlined_call_operand.vmem [shape: f32[1,128], index: 2, kind: input, shape index: {}]   ;;  %s775_s3 = inlined_call_operand.hbm [shape: f32[128,128], index: 3, kind: output, shape index: {}]  }
   0x1   :  { %10 = vsyncpa [#allocation4 + $0x1], 0  ;;  %s653_s12 = smov 0   ;;  %s655_s13 = smov 0  }
   0x2   :  { %s657_s14 = smov 0   ;;  %s659_s15 = smov 0  }
   0x3   :  { %s661_s16 = smov 0   ;;  %s663_s17 = smov 0  }
   0x4 LB: > { %s459_s18 = sadd.s32 4294967295, %s628_s17   ;;  %s460_s19 = sadd.s32 4294967294, %s628_s17   ;;  %s628_s17 = sphi %s663_s17, %s16_s17   ;;  %s624_s16 = sphi %s661_s16, %s782_s16   ;;  %s620_s15 = sphi %s659_s15, %s781_s15   ;;  %s616_s14 = sphi %s657_s14, %s780_s14   ;;  %s612_s13 = sphi %s655_s13, %s779_s13   ;;  %s608_s12 = sphi %s653_s12, %s778_s12  }
   0x5   : > { %s28_s20 = sadd.s32 1, %s624_s16  ;;  %s110_s21 = sadd.s32 1, %s616_s14 }
   0x6   : > { %p30_p0 = scmp.ge.s32.totalorder %s28_s20, 4  ;;  %p120_p1 = scmp.ne.s32.totalorder %s616_s14, %s612_s13 }
   0x7   : > { %p121_p2 = scmp.eq.s32.totalorder %s459_s18, 3  ;;  %p126_p3 = scmp.ne.s32.totalorder %s612_s13, %s608_s12 }
   0x8   : > { %s784_s20 = smov (%p30_p0, %s28_s20), 0  ;;  %p127_p5 = scmp.eq.s32.totalorder %s460_s19, 3 }
   0x9   : > { %p693_p4 = por %p121_p2, %p120_p1  ;;  %s107_s23 = ssub.s32 %s624_s16, %s784_s20 }
   0xa   : > { %p464_p6 = scmp.ge.s32.totalorder %s628_s17, 1  ;;  %p108_p7 = scmp.eq.s32.totalorder %s107_s23, 0 }
   0xb   : > { %p700_p8 = por %p127_p5, %p126_p3  ;;  %p167_p9 = scmp.lt.s32.totalorder %s628_s17, 5 }
   0xc   : > { %s706_s25 = scalar_select %p108_p7, %s616_s14, %s110_s21  }
   0xd   : > { %p168_p10 = pnand %p464_p6, %p167_p9 }
   0xe   : > { %s466_s28 = sshll.u32 (!%p168_p10), %s620_s15, 2  ;;  %s195_s6 = sand.u32 (!%p168_p10), 1, %s612_s13  }
   0xf   : > { %171 = sbr.rel (%p168_p10) target bundleno = 236 (0xec), region = 32  ;;  %p199_p11 = scmp.lt.s32.totalorder (!%p168_p10), %s466_s28, 15 }
  0x10   : > { %s465_s7 = sshll.u32 (!%p168_p10), %s195_s6, 5  ;;  %s479_s18 = sshll.u32 (!%p168_p10), %s620_s15, 9 }
  0x11   : > { %s197_s10 = scalar_lea.vmem (!%p168_p10), [#allocation3], %s465_s7  ;;  %s725_s23 = scalar_lea.hbm (!%p168_p10), %s775_s3, %s479_s18 }
  0x12   : > { %s371_s11 = sshll.u32 (!%p168_p10), %s197_s10, 4  ;;  %s727_s15 = scalar_lea.sflag (!%p168_p10), [#allocation4], %s195_s6  ;;  %s720_s11 = int_to_ptr.vmem [resolvable:$true] %s371_s11 }
  0x13   : > { %s552_s26 = scalar_lea.vmem (!%p168_p10), %s720_s11, 512  ;;  %s630_s27 = smov (!%p168_p10), [#allocation3]  }
  0x14   : > { %v228_v0 = vld [vmem:[%s773_s1] sm:$0xf]  ;;  %vm242_vm0 = vcmask 1043456   ;;  %s786_s28 = smov (!%p199_p11, %s466_s28), 15  ;;  %vm229_vm1 = vcmask 31744   ;;  %p553_p12 = scmp.ne.s32.totalorder %s720_s11, %s552_s26 }
  0x15   : > { %485 = vmatprep.subr.msk.mxu0 %vm242_vm0, %v228_v0  ;;  %493 = vmatprep.subr.msk.mxu1 %vm242_vm0, %v228_v0  ;;  %s467_s29 = sshll.u32 %s786_s28, 3  ;;  %v473_v5 = vld [vmem:[%s774_s2] ss:$0 sm:$0xff]  ;;  %s556_s28 = sshll.u32 %s630_s27, 4  ;;  %s557_s28 = int_to_ptr.vmem [resolvable:$false] %s556_s28 }
  0x16   : > { %486 = vmatpush3.msk.msra.mxu0 %vm242_vm0, %v228_v0  ;;  %494 = vmatpush3.msk.msra.mxu1 %vm242_vm0, %v228_v0  ;;  %s205_s5 = scalar_lea.vmem %s772_s0, %s467_s29  ;;  %p554_p13 = pnand %p553_p12, %p693_p4 }
  0x17   : > { %v224_v1 = vld [vmem:[%s205_s5] sm:$0xff]  ;;  %v226_v2 = vld [vmem:[%s205_s5 + $0x10] sm:$0xff]  ;;  %v225_v3 = vld [vmem:[%s205_s5 + $0x8] sm:$0xff]  ;;  %s558_s29 = scalar_lea.vmem %s557_s28, 1024  ;;  %p559_p1 = scmp.lt.s32.totalorder %s720_s11, %s557_s28 }
  0x18   : > { %487 = vmatprep.mubr.msk.f32.mxu0 %vm229_vm1, %v224_v1  ;;  %490 = vmatprep.mubr.msk.f32.mxu1 %vm229_vm1, %v226_v2  ;;  %v227_v4 = vld [vmem:[%s205_s5 + $0x18] sm:$0xff]  ;;  %p555_p0 = pneg %p554_p13  ;;  %p560_p2 = scmp.lt.s32.totalorder %s558_s29, %s552_s26 }
  0x19   : > { %488 = vmatmul.mubr.msk.f32.vlgmr.msra.gmra.mxu0 %vm229_vm1, %v225_v3  ;;  %491 = vmatmul.mubr.msk.f32.vlgmr.msra.gmra.mxu1 %vm229_vm1, %v227_v4 }
  0x1a   : > { %p561_p3 = por %p560_p2, %p559_p1 }
  0x1c   : > { %p562_p5 = pnand %p561_p3, %p555_p0 }
  0xd9   : > { %v489_v6 = vpop.f32.mrf.mxu0  ;;  %v492_v7 = vpop.f32.mrf.mxu1 }
  0xda   : > { %v350_v8 = vadd.f32 %v489_v6, %v473_v5  ;;  %v352_v9 = vadd.f32 %v492_v7, %v473_v5 }
  0xdb   : > { %v312_v10 = vpop.f32.mrf.mxu0  ;;  %v322_v11 = vpop.f32.mrf.mxu1 }
  0xdc   : > { %354 = vst [vmem:[%s197_s10 + $0x8] sm:$0xff] %v350_v8  ;;  %356 = vst [vmem:[%s197_s10 + $0x18] sm:$0xff] %v352_v9  ;;  %v349_v12 = vadd.f32 %v473_v5, %v312_v10  ;;  %v351_v13 = vadd.f32 %v473_v5, %v322_v11 }
  0xde   : > { %353 = vst [vmem:[%s197_s10] sm:$0xff] %v349_v12  ;;  %355 = vst [vmem:[%s197_s10 + $0x10] sm:$0xff] %v351_v13 }
  0xdf   : > { %565 = shalt.err (!%p562_p5)
}
  0xe0   : > { %s566_s30 = scalar_lea.hbm %s725_s23, 512  ;;  %s570_s6 = scalar_lea.hbm %s775_s3, 2048 }
  0xe1   : > { %p567_p6 = scmp.ne.s32.totalorder %s725_s23, %s566_s30  ;;  %p571_p10 = scmp.lt.s32.totalorder %s725_s23, %s775_s3 }
  0xe2   : > { %p572_p11 = scmp.lt.s32.totalorder %s570_s6, %s566_s30 }
  0xe3   : > { %p568_p7 = pnand %p567_p6, %p693_p4 }
  0xe4   : > { %p573_p12 = por %p572_p11, %p571_p10 }
  0xe5   : > { %p569_p9 = pneg %p568_p7 }
  0xe7   : > { %p574_p13 = pnand %p573_p12, %p569_p9 }
  0xe9   : > { %577 = shalt.err (!%p574_p13)
}
  0xea   : > { %s631_s9 = smov 128   ;;  %s632_s10 = smov 8  }
  0xeb   : > { %495 = dma.vmem_to_hbm [thread:$0]  (%p693_p4), %s720_s11, 512, %s725_s23, %s727_s15, %s631_s9, %s631_s9, %s632_s10  }
  0xec PF: > { %p501_p0 = scmp.ge.s32.totalorder %s628_s17, 2  ;;  %s386_s18 = sand.u32 1, %s608_s12  }
  0xed   : > { %s387_s19 = scalar_lea.sflag [#allocation4], %s386_s18 }
  0xee   : > { %p498_p1 = pnand %p501_p0, %p700_p8 }
  0xf0   : > { %p499_p2 = pneg %p498_p1 }
  0xf2   : > { %603 = dma.done.wait (%p499_p2), %s387_s19, 512  }
  0xf3   : > { %605 = vsyncadd (%p499_p2), %s387_s19, 4294966784  ;;  %s16_s17 = sadd.s32 1, %s628_s17   ;;  %s778_s12 = smov %s612_s13 }
  0xf4   : > { %p13_p3 = scmp.ge.s32.totalorder %s16_s17, 6   ;;  %s779_s13 = smov %s616_s14 }
  0xf5   : > { %s780_s14 = smov %s706_s25  ;;  %s781_s15 = smov %s624_s16 }
  0xf6   : > { %s782_s16 = smov %s784_s20  ;;  %15 = sbr.rel (!%p13_p3) target bundleno = 4 (0x4), region = 78 }
  0xfb   :  { %392 = vsyncpa [#allocation4], 1 }
  0xfc   :  { %394 = vsyncpa [#allocation4 + $0x1], 1 }

</bundles_post_ra>
